<compile_context>
chip_gen: v7x
topology: tpu7x:2x2x1
jax: 0.10.0
libtpu: 0.0.40
codegen_flags: <defaults>
</compile_context>

<pallas_src>
from functools import partial

import jax
import jax.numpy as jnp
from jax.experimental import pallas as pl
from jax.experimental.pallas import tpu as pltpu

EPS = 1e-5
LANE = 128
SUBLANE_BF16 = 16  # bf16 packs 16 rows per sublane-tile


def _round_up(n, m):
    return (n + m - 1) // m * m


# ---------------- Fused Pallas kernel (whole forward pass) ------------------

def _make_fused_kernel(num_layers, d_pad, w_lanes):
    """kernel(x, w_slab, b_slab, o)

    w_slab rows: [0, d_pad)           -> layer-0 weight   [d_pad, W]
                 [d_pad + (i-1)*W, .) -> layer-i weight   [W, W]     (i>0)
                 last W rows          -> fc weight        [W, W]
    b_slab[i] is the folded bias of layer i, shape [1, W] (f32).
    """

    def kernel(x_ref, w_ref, b_ref, o_ref):
        h = x_ref[...]                                     # [B_pad, D_pad] bf16
        row = 0
        for i in range(num_layers):
            rows = d_pad if i == 0 else w_lanes
            w_i = w_ref[pl.ds(row, rows), :]               # static, tile-aligned
            row += rows
            # Linear + folded BN(eval) (+ folded noise for i==0), f32 accumulate.
            z = jnp.dot(h, w_i, preferred_element_type=jnp.float32)
            z = z + b_ref[i]                               # [1, W] f32 broadcast
            h = jnp.maximum(z, 0.0).astype(jnp.bfloat16)   # ReLU, back to bf16
        fc_w = w_ref[pl.ds(row, w_lanes), :]
        o_ref[...] = jnp.dot(
            h, fc_w, preferred_element_type=jnp.float32
        ).astype(o_ref.dtype)

    return kernel


# ---------------- Parameter setup (deterministic, PyTorch-style init) -------

def init_params(key, input_size, hidden_size, num_layers, num_classes):
    params = {}
    key, k = jax.random.split(key)
    params["noise"] = (jax.random.normal(k, (input_size,)) * 0.001).astype(jnp.float32)

    layers = []
    for i in range(num_layers):
        in_f = input_size if i == 0 else hidden_size
        bound = 1.0 / float(in_f) ** 0.5
        key, kw, kb = jax.random.split(key, 3)
        w = jax.random.uniform(kw, (in_f, hidden_size), minval=-bound, maxval=bound)
        b = jax.random.uniform(kb, (hidden_size,), minval=-bound, maxval=bound)
        layers.append(dict(
            w=w.astype(jnp.float32),
            b=b.astype(jnp.float32),
            gamma=jnp.ones((hidden_size,), jnp.float32),
            beta=jnp.zeros((hidden_size,), jnp.float32),
            mean=jnp.zeros((hidden_size,), jnp.float32),   # BN running_mean init
            var=jnp.ones((hidden_size,), jnp.float32),     # BN running_var init
        ))
    params["layers"] = layers

    key, kw = jax.random.split(key)
    bound = 1.0 / float(hidden_size) ** 0.5
    params["fc_w"] = jax.random.uniform(
        kw, (hidden_size, num_classes), minval=-bound, maxval=bound
    ).astype(jnp.float32)
    return params


# ---------------- One-time fold + pad + pack (hoisted out of per-call jit) --

def prepare_params(params):
    """Fold BN(eval)+noise into W/b, zero-pad to lane-dense shapes, pack into a
    single bf16 weight slab and a single f32 bias slab.  Call once."""
    num_layers = len(params["layers"])
    input_size, hidden = params["layers"][0]["w"].shape
    num_classes = params["fc_w"].shape[1]

    D_pad = _round_up(input_size, LANE)
    W = max(_round_up(hidden, LANE), _round_up(num_classes, LANE))

    w_blocks, b_blocks = [], []
    for i, lp in enumerate(params["layers"]):
        scale = lp["gamma"] * jax.lax.rsqrt(lp["var"] + EPS)
        w = lp["w"] * scale[None, :]
        b = (lp["b"] - lp["mean"]) * scale + lp["beta"]
        if i == 0:
            b = b + params["noise"] @ w        # (x+noise)@W' == x@W' + noise@W'
        rows = D_pad if i == 0 else W
        w_p = jnp.zeros((rows, W), jnp.float32).at[: w.shape[0], :hidden].set(w)
        b_p = jnp.zeros((1, W), jnp.float32).at[0, :hidden].set(b)
        w_blocks.append(w_p)
        b_blocks.append(b_p)

    fc_p = jnp.zeros((W, W), jnp.float32).at[:hidden, :num_classes].set(params["fc_w"])
    w_blocks.append(fc_p)

    # Zero-padded rows/lanes provably contribute zero through the network:
    # zero bias lanes -> relu(0)=0 -> zero weight rows downstream.
    w_slab = jnp.concatenate(w_blocks, axis=0).astype(jnp.bfloat16)   # [D_pad+L*W, W]
    b_slab = jnp.stack(b_blocks, axis=0)                              # [L, 1, W] f32

    meta = dict(num_layers=num_layers, hidden=hidden,
                num_classes=num_classes, input_size=input_size)
    return w_slab, b_slab, meta


# ---------------- Model forward (pad/cast x in JAX, compute in Pallas) ------

@partial(jax.jit,
         static_argnames=("num_layers", "hidden", "num_classes", "input_size"))
def robust_mlp_forward(x, w_slab, b_slab, *, num_layers, hidden, num_classes,
                       input_size):
    B = x.shape[0]
    xf = x.reshape(B, -1).astype(jnp.float32)              # x.view(x.size(0), -1)
    D = xf.shape[1]

    D_pad = _round_up(D, LANE)
    W = max(_round_up(hidden, LANE), _round_up(num_classes, LANE))
    B_pad = _round_up(B, SUBLANE_BF16)

    x_p = jnp.zeros((B_pad, D_pad), jnp.bfloat16).at[:B, :D].set(
        xf.astype(jnp.bfloat16))

    flops = 2 * B_pad * (D_pad * W + num_layers * W * W)
    bytes_accessed = (2 * (x_p.size + w_slab.size)          # bf16 inputs
                      + 4 * (b_slab.size + B_pad * W))      # f32 bias + out
    total_vmem = bytes_accessed
    vmem_limit = int(min(64 * 1024 * 1024,
                         max(4 * 1024 * 1024, 2 * total_vmem)))

    out_pad = pl.pallas_call(
        _make_fused_kernel(num_layers, D_pad, W),
        out_shape=jax.ShapeDtypeStruct((B_pad, W), jnp.float32),
        in_specs=[pl.BlockSpec(memory_space=pltpu.MemorySpace.VMEM)] * 3,
        out_specs=pl.BlockSpec(memory_space=pltpu.MemorySpace.VMEM),
        compiler_params=pltpu.CompilerParams(vmem_limit_bytes=vmem_limit),
        cost_estimate=pl.CostEstimate(
            flops=flops, transcendentals=0, bytes_accessed=bytes_accessed),
    )(x_p, w_slab, b_slab)

    return out_pad[:B, :num_classes]


# ---------------- Pure-JAX f32 reference (unfused, for correctness check) ---

def reference_forward(params, x):
    B = x.shape[0]
    out = x.reshape(B, -1).astype(jnp.float32) + params["noise"][None, :]
    for lp in params["layers"]:
        z = out @ lp["w"] + lp["b"]
        inv = jax.lax.rsqrt(lp["var"] + EPS)
        y = (z - lp["mean"]) * inv * lp["gamma"] + lp["beta"]
        out = jnp.maximum(y, 0.0)
    return out @ params["fc_w"]


if __name__ == "__main__":
    # dataset='mnist' -> input_size = 28*28 = 784, num_classes = 10
    batch, num_layers, hidden_size = 8, 2, 32
    input_size, num_classes = 28 * 28, 10

    key = jax.random.PRNGKey(0)
    key, kx, kp = jax.random.split(key, 3)
    x = jax.random.normal(kx, (batch, 1, 28, 28), dtype=jnp.float32)   # NCHW
    params = init_params(kp, input_size, hidden_size, num_layers, num_classes)

    # One-time fold/pad/pack (hoisted out of the serving path).
    w_slab, b_slab, meta = prepare_params(params)

    out = robust_mlp_forward(x, w_slab, b_slab, **meta)
    out = jax.block_until_ready(out)
    assert out.shape == (batch, num_classes), out.shape

    # f32 reference; tolerance widened to match bf16 weight/activation storage
    # (accumulation stays f32 in the kernel).
    ref = reference_forward(params, x)
    max_err = float(jnp.max(jnp.abs(out - ref)))
    assert jnp.allclose(out, ref, rtol=2e-2, atol=2e-2), max_err

    print("KERNEL_OK")
</pallas_src>

<mosaic_0001>
module attributes {stable_mosaic.version = 11 : i64} {
  func.func @kernel(%arg0: memref<16x896xbf16, #tpu.memory_space<vmem>>, %arg1: memref<1152x128xbf16, #tpu.memory_space<vmem>>, %arg2: memref<2x1x128xf32, #tpu.memory_space<vmem>>, %arg3: memref<16x128xf32, #tpu.memory_space<vmem>>) attributes {dimension_semantics = [], scalar_prefetch = 0 : i64, scratch_operands = 0 : i64, tpu.core_type = #tpu.core_type<tc>} {
    %c0 = arith.constant 0 : index
    %c0_0 = arith.constant 0 : index
    %0 = vector.load %arg0[%c0, %c0_0] : memref<16x896xbf16, #tpu.memory_space<vmem>>, vector<16x896xbf16>
    %c0_1 = arith.constant 0 : index
    %c0_2 = arith.constant 0 : index
    %1 = vector.load %arg1[%c0_1, %c0_2] : memref<1152x128xbf16, #tpu.memory_space<vmem>>, vector<896x128xbf16>
    %cst = arith.constant dense<0.000000e+00> : vector<16x128xf32>
    %2 = tpu.matmul %0, %1, %cst {dimension_numbers = #tpu.dot_dimension_numbers<[1], [0], [0], [1], [0, 0, 1, 1], [], []>} : vector<16x896xbf16>, vector<896x128xbf16>, vector<16x128xf32> -> vector<16x128xf32>
    %c0_3 = arith.constant 0 : index
    %c0_4 = arith.constant 0 : index
    %c0_5 = arith.constant 0 : index
    %3 = vector.load %arg2[%c0_3, %c0_4, %c0_5] : memref<2x1x128xf32, #tpu.memory_space<vmem>>, vector<1x1x128xf32>
    %4 = vector.shape_cast %3 : vector<1x1x128xf32> to vector<1x128xf32>
    %5 = vector.broadcast %4 : vector<1x128xf32> to vector<16x128xf32>
    %6 = arith.addf %2, %5 : vector<16x128xf32>
    %cst_6 = arith.constant 0.000000e+00 : f32
    %7 = vector.broadcast %cst_6 : f32 to vector<16x128xf32>
    %8 = arith.maximumf %6, %7 : vector<16x128xf32>
    %9 = arith.truncf %8 : vector<16x128xf32> to vector<16x128xbf16>
    %c896 = arith.constant 896 : index
    %c0_7 = arith.constant 0 : index
    %10 = vector.load %arg1[%c896, %c0_7] : memref<1152x128xbf16, #tpu.memory_space<vmem>>, vector<128x128xbf16>
    %cst_8 = arith.constant dense<0.000000e+00> : vector<16x128xf32>
    %11 = tpu.matmul %9, %10, %cst_8 {dimension_numbers = #tpu.dot_dimension_numbers<[1], [0], [0], [1], [0, 0, 1, 1], [], []>} : vector<16x128xbf16>, vector<128x128xbf16>, vector<16x128xf32> -> vector<16x128xf32>
    %c1 = arith.constant 1 : index
    %c0_9 = arith.constant 0 : index
    %c0_10 = arith.constant 0 : index
    %12 = vector.load %arg2[%c1, %c0_9, %c0_10] : memref<2x1x128xf32, #tpu.memory_space<vmem>>, vector<1x1x128xf32>
    %13 = vector.shape_cast %12 : vector<1x1x128xf32> to vector<1x128xf32>
    %14 = vector.broadcast %13 : vector<1x128xf32> to vector<16x128xf32>
    %15 = arith.addf %11, %14 : vector<16x128xf32>
    %cst_11 = arith.constant 0.000000e+00 : f32
    %16 = vector.broadcast %cst_11 : f32 to vector<16x128xf32>
    %17 = arith.maximumf %15, %16 : vector<16x128xf32>
    %18 = arith.truncf %17 : vector<16x128xf32> to vector<16x128xbf16>
    %c1024 = arith.constant 1024 : index
    %c0_12 = arith.constant 0 : index
    %19 = vector.load %arg1[%c1024, %c0_12] : memref<1152x128xbf16, #tpu.memory_space<vmem>>, vector<128x128xbf16>
    %cst_13 = arith.constant dense<0.000000e+00> : vector<16x128xf32>
    %20 = tpu.matmul %18, %19, %cst_13 {dimension_numbers = #tpu.dot_dimension_numbers<[1], [0], [0], [1], [0, 0, 1, 1], [], []>} : vector<16x128xbf16>, vector<128x128xbf16>, vector<16x128xf32> -> vector<16x128xf32>
    %c0_14 = arith.constant 0 : index
    %c0_15 = arith.constant 0 : index
    %21 = vector.load %arg3[%c0_14, %c0_15] : memref<16x128xf32, #tpu.memory_space<vmem>>, vector<16x128xf32>
    tpu.vector_store %arg3[%c0_14, %c0_15], %20 {strides = array<i32>} : memref<16x128xf32, #tpu.memory_space<vmem>>, vector<16x128xf32>,
    return
  }
}

</mosaic_0001>

<bundles_post_ra>
// kernel: robust_mlp_forward.1
= control target key start
LH: loop header
LB: loop body
LE: loop exit
PB: predicated region body
PF: predicated region fallthrough
CT: control target
= control target key end

     0   :  { %v1227_v38 = vmov 0.0   ;;  %vm1228_vm0 = vmmov 0   ;;  %s1528_s1 = inlined_call_operand.vmem [shape: bf16[1152,128], index: 1, kind: input, shape index: {}]   ;;  %s1529_s0 = inlined_call_operand.vmem [shape: bf16[16,896], index: 0, kind: input, shape index: {}]   ;;  %s1530_s2 = inlined_call_operand.vmem [shape: f32[2,1,128], index: 2, kind: input, shape index: {}]   ;;  %s1531_s3 = inlined_call_operand.vmem [shape: f32[16,128], index: 3, kind: output, shape index: {}]  }
   0x1   :  { %v1145_v0 = vld [vmem:[%s1528_s1 + $0x40] sm:$0xff]   ;;  %v1149_v4 = vld [vmem:[%s1528_s1 + $0x48] sm:$0xff]   ;;  %v1153_v8 = vld [vmem:[%s1528_s1 + $0x50] sm:$0xff]  }
   0x2   :  { %v1146_v1 = vld [vmem:[%s1528_s1] sm:$0xff]   ;;  %990 = vmatprep.subr.bf16.mxu0 %v1145_v0  ;;  %v1150_v5 = vld [vmem:[%s1528_s1 + $0x8] sm:$0xff]   ;;  %v1154_v9 = vld [vmem:[%s1528_s1 + $0x10] sm:$0xff]  }
   0x3   :  { %v1147_v2 = vld [vmem:[%s1528_s1 + $0xc0] sm:$0xff]   ;;  %991 = vmatpush3.bf16.msra.mxu0 %v1146_v1  ;;  %v1151_v6 = vld [vmem:[%s1528_s1 + $0xc8] sm:$0xff]   ;;  %v1155_v10 = vld [vmem:[%s1528_s1 + $0xd0] sm:$0xff]  }
   0x4   :  { %v1148_v3 = vld [vmem:[%s1528_s1 + $0x80] sm:$0xff]   ;;  %1012 = vmatprep.subr.bf16.mxu1 %v1147_v2  ;;  %992 = vmatprep.subr.bf16.mxu0 %v1149_v4  ;;  %v1152_v7 = vld [vmem:[%s1528_s1 + $0x88] sm:$0xff]   ;;  %v1156_v11 = vld [vmem:[%s1528_s1 + $0x90] sm:$0xff]  }
   0x5   :  { %1013 = vmatpush3.bf16.msra.mxu1 %v1148_v3  ;;  %v1157_v12 = vld [vmem:[%s1528_s1 + $0x58] sm:$0xff]   ;;  %v1161_v16 = vld [vmem:[%s1528_s1 + $0x60] sm:$0xff]   ;;  %v1165_v20 = vld [vmem:[%s1528_s1 + $0x68] sm:$0xff]  }
   0x6   :  { %1014 = vmatprep.subr.bf16.mxu1 %v1151_v6  ;;  %v1158_v13 = vld [vmem:[%s1528_s1 + $0x18] sm:$0xff]   ;;  %v1162_v17 = vld [vmem:[%s1528_s1 + $0x20] sm:$0xff]   ;;  %v1166_v21 = vld [vmem:[%s1528_s1 + $0x28] sm:$0xff]  }
   0x7   :  { %993 = vmatpush3.bf16.msra.mxu0 %v1150_v5  ;;  %v1159_v14 = vld [vmem:[%s1528_s1 + $0xd8] sm:$0xff]   ;;  %v1163_v18 = vld [vmem:[%s1528_s1 + $0xe0] sm:$0xff]   ;;  %v1167_v22 = vld [vmem:[%s1528_s1 + $0xe8] sm:$0xff]  }
   0x8   :  { %994 = vmatprep.subr.bf16.mxu0 %v1153_v8  ;;  %v1160_v15 = vld [vmem:[%s1528_s1 + $0x98] sm:$0xff]   ;;  %v1164_v19 = vld [vmem:[%s1528_s1 + $0xa0] sm:$0xff]   ;;  %v1168_v23 = vld [vmem:[%s1528_s1 + $0xa8] sm:$0xff]  }
   0x9   :  { %1015 = vmatpush3.bf16.msra.mxu1 %v1152_v7  ;;  %v1169_v24 = vld [vmem:[%s1528_s1 + $0x70] sm:$0xff]   ;;  %v1173_v28 = vld [vmem:[%s1528_s1 + $0x78] sm:$0xff]   ;;  %v1178_v32 = vld [vmem:[%s1529_s0 + $0x4] ss:$28 sps:$4 sm:$0xff]  }
   0xa   :  { %1016 = vmatprep.subr.bf16.mxu1 %v1155_v10  ;;  %v1170_v25 = vld [vmem:[%s1528_s1 + $0x30] sm:$0xff]   ;;  %v1174_v29 = vld [vmem:[%s1528_s1 + $0x38] sm:$0xff]   ;;  %546 = vmatprep.mubr.bf16.mxu0 %v1178_v32  ;;  %v1180_v34 = vld [vmem:[%s1528_s1 + $0x140] sm:$0xff]  }
   0xb   :  { %995 = vmatpush3.bf16.msra.mxu0 %v1154_v9  ;;  %v1171_v26 = vld [vmem:[%s1528_s1 + $0xf0] sm:$0xff]   ;;  %v1175_v30 = vld [vmem:[%s1528_s1 + $0xf8] sm:$0xff]   ;;  %v1181_v35 = vld [vmem:[%s1529_s0 + $0x8] ss:$28 sps:$4 sm:$0xff]  }
   0xc   :  { %996 = vmatprep.subr.bf16.mxu0 %v1157_v12  ;;  %v1172_v27 = vld [vmem:[%s1528_s1 + $0xb0] sm:$0xff]   ;;  %v1176_v31 = vld [vmem:[%s1529_s0] ss:$28 sps:$4 sm:$0xff]   ;;  %v1183_v36 = vld [vmem:[%s1529_s0 + $0xc] ss:$28 sps:$4 sm:$0xff]  }
   0xd   :  { %1017 = vmatpush3.bf16.msra.mxu1 %v1156_v11  ;;  %v1179_v33 = vld [vmem:[%s1528_s1 + $0xb8] sm:$0xff]   ;;  %v1184_v37 = vld [vmem:[%s1528_s1 + $0x100] sm:$0xff]   ;;  %587 = vmatprep.mubr.bf16.mxu1 %v1183_v36  ;;  %v1186_v40 = vld [vmem:[%s1528_s1 + $0x148] sm:$0xff]  }
   0xe   :  { %1018 = vmatprep.subr.bf16.mxu1 %v1159_v14  ;;  %v1185_v39 = vld [vmem:[%s1528_s1 + $0x180] sm:$0xff]   ;;  %v1187_v41 = vld [vmem:[%s1528_s1 + $0x108] sm:$0xff]   ;;  %v1189_v43 = vld [vmem:[%s1528_s1 + $0x150] sm:$0xff]  }
   0xf   :  { %997 = vmatpush3.bf16.msra.mxu0 %v1158_v13  ;;  %v1188_v42 = vld [vmem:[%s1528_s1 + $0x188] sm:$0xff]   ;;  %v1190_v44 = vld [vmem:[%s1528_s1 + $0x110] sm:$0xff]   ;;  %v1192_v46 = vld [vmem:[%s1528_s1 + $0x158] sm:$0xff]  }
  0x10   :  { %998 = vmatprep.subr.bf16.mxu0 %v1161_v16  ;;  %v1191_v45 = vld [vmem:[%s1528_s1 + $0x190] sm:$0xff]   ;;  %v1193_v47 = vld [vmem:[%s1528_s1 + $0x118] sm:$0xff]   ;;  %v1195_v49 = vld [vmem:[%s1528_s1 + $0x160] sm:$0xff]  }
  0x11   :  { %1019 = vmatpush3.bf16.msra.mxu1 %v1160_v15  ;;  %v1194_v48 = vld [vmem:[%s1528_s1 + $0x198] sm:$0xff]   ;;  %v1196_v50 = vld [vmem:[%s1528_s1 + $0x120] sm:$0xff]   ;;  %v1198_v52 = vld [vmem:[%s1528_s1 + $0x168] sm:$0xff]  }
  0x12   :  { %1020 = vmatprep.subr.bf16.mxu1 %v1163_v18  ;;  %v1197_v51 = vld [vmem:[%s1528_s1 + $0x1a0] sm:$0xff]   ;;  %v1199_v53 = vld [vmem:[%s1528_s1 + $0x128] sm:$0xff]   ;;  %v1201_v55 = vld [vmem:[%s1528_s1 + $0x170] sm:$0xff]  }
  0x13   :  { %999 = vmatpush3.bf16.msra.mxu0 %v1162_v17  ;;  %v1200_v54 = vld [vmem:[%s1528_s1 + $0x1a8] sm:$0xff]   ;;  %v1202_v56 = vld [vmem:[%s1528_s1 + $0x130] sm:$0xff]   ;;  %v1204_v59 = vld [vmem:[%s1528_s1 + $0x178] sm:$0xff]  }
  0x14   :  { %1000 = vmatprep.subr.bf16.mxu0 %v1165_v20  ;;  %v1203_v57 = vld [vmem:[%s1528_s1 + $0x1b0] sm:$0xff]   ;;  %v1205_v60 = vld [vmem:[%s1528_s1 + $0x138] sm:$0xff]   ;;  %v1211_v0 = vld [vmem:[%s1528_s1 + $0x1c0] sm:$0xff]  }
  0x15   :  { %1021 = vmatpush3.bf16.msra.mxu1 %v1164_v19  ;;  %v1208_v58 = vld [vmem:[%s1529_s0 + $0x14] ss:$28 sps:$4 sm:$0xff]   ;;  %v1209_v61 = vld [vmem:[%s1528_s1 + $0x1b8] sm:$0xff]   ;;  %v1212_v1 = vld [vmem:[%s1528_s1 + $0x1c8] sm:$0xff]  }
  0x16   :  { %1022 = vmatprep.subr.bf16.mxu1 %v1167_v22  ;;  %v1206_v62 = vld [vmem:[%s1529_s0 + $0x10] ss:$28 sps:$4 sm:$0xff]   ;;  %v1210_v63 = vld [vmem:[%s1529_s0 + $0x18] ss:$28 sps:$4 sm:$0xff]   ;;  %v1215_v4 = vld [vmem:[%s1528_s1 + $0x1e0] sm:$0xff]  }
  0x17   :  { %1001 = vmatpush3.bf16.msra.mxu0 %v1166_v21  ;;  %v1213_v2 = vld [vmem:[%s1528_s1 + $0x1d0] sm:$0xff]   ;;  %v1214_v3 = vld [vmem:[%s1528_s1 + $0x1d8] sm:$0xff]   ;;  %v1216_v5 = vld [vmem:[%s1528_s1 + $0x1e8] sm:$0xff]  }
  0x18   :  { %1002 = vmatprep.subr.bf16.mxu0 %v1169_v24  ;;  %v1217_v6 = vld [vmem:[%s1528_s1 + $0x1f0] sm:$0xff]   ;;  %v1218_v7 = vld [vmem:[%s1528_s1 + $0x1f8] sm:$0xff]   ;;  %v1219_v8 = vld [vmem:[%s1528_s1 + $0x200] sm:$0xff]  }
  0x19   :  { %1023 = vmatpush3.bf16.msra.mxu1 %v1168_v23  ;;  %v1220_v9 = vld [vmem:[%s1528_s1 + $0x208] sm:$0xff]   ;;  %v1221_v10 = vld [vmem:[%s1528_s1 + $0x210] sm:$0xff]   ;;  %v1222_v11 = vld [vmem:[%s1528_s1 + $0x218] sm:$0xff]  }
  0x1a   :  { %1024 = vmatprep.subr.bf16.mxu1 %v1171_v26  ;;  %v1223_v12 = vld [vmem:[%s1528_s1 + $0x220] sm:$0xff]   ;;  %v1224_v13 = vld [vmem:[%s1528_s1 + $0x228] sm:$0xff]  }
  0x1b   :  { %1003 = vmatpush3.bf16.msra.mxu0 %v1170_v25  ;;  %v908_v15 = vld [vmem:[%s1530_s2] ss:$0 sm:$0xff] }
  0x1c   :  { %1004 = vmatprep.subr.bf16.mxu0 %v1173_v28 }
  0x1d   :  { %1025 = vmatpush3.bf16.msra.mxu1 %v1172_v27 }
  0x1e   :  { %1026 = vmatprep.subr.bf16.mxu1 %v1175_v30 }
  0x1f   :  { %1005 = vmatpush3.bf16.msra.mxu0 %v1174_v29 }
  0x20   :  { %1034 = vmatprep.subr.bf16.mxu0 %v1180_v34 }
  0x21   :  { %1027 = vmatpush3.bf16.msra.mxu1 %v1179_v33 }
  0x22   :  { %547 = vmatmul.mubr.bf16.vlgmr.msra.gmra.mrb[0].mxu0 %v1176_v31  ;;  %1083 = vmatprep.subr.bf16.mxu1 %v1227_v38 }
  0x23   :  { %1035 = vmatpush3.bf16.msra.mxu0 %v1184_v37  ;;  %628 = vmatprep.mubr.bf16.mxu0 %v1208_v58 }
  0x24   :  { %588 = vmatmul.mubr.bf16.vlgmr.msra.gmra.mrb[0].mxu1 %v1181_v35  ;;  %1036 = vmatprep.subr.bf16.mxu0 %v1186_v40 }
  0x25   :  { %1084 = vmatpush3.bf16.msra.mxu1 %v1185_v39  ;;  %1099 = vmatprep.mubr.msk.bf16.mxu1 %vm1228_vm0, %v1227_v38 }
  0x26   :  { %1085 = vmatprep.subr.bf16.mxu1 %v1227_v38 }
  0x27   :  { %1037 = vmatpush3.bf16.msra.mxu0 %v1187_v41 }
  0x28   :  { %1038 = vmatprep.subr.bf16.mxu0 %v1189_v43 }
  0x29   :  { %1086 = vmatpush3.bf16.msra.mxu1 %v1188_v42 }
  0x2a   :  { %1087 = vmatprep.subr.bf16.mxu1 %v1227_v38 }
  0x2b   :  { %1039 = vmatpush3.bf16.msra.mxu0 %v1190_v44 }
  0x2c   :  { %1040 = vmatprep.subr.bf16.mxu0 %v1192_v46 }
  0x2d   :  { %1088 = vmatpush3.bf16.msra.mxu1 %v1191_v45 }
  0x2e   :  { %1089 = vmatprep.subr.bf16.mxu1 %v1227_v38 }
  0x2f   :  { %1041 = vmatpush3.bf16.msra.mxu0 %v1193_v47 }
  0x30   :  { %1042 = vmatprep.subr.bf16.mxu0 %v1195_v49  ;;  %v1225_v49 = vld [vmem:[%s1528_s1 + $0x230] sm:$0xff]  }
  0x31   :  { %1090 = vmatpush3.bf16.msra.mxu1 %v1194_v48 }
  0x32   :  { %1091 = vmatprep.subr.bf16.mxu1 %v1227_v38 }
  0x33   :  { %1043 = vmatpush3.bf16.msra.mxu0 %v1196_v50  ;;  %v1226_v50 = vld [vmem:[%s1528_s1 + $0x238] sm:$0xff]  }
  0x34   :  { %1044 = vmatprep.subr.bf16.mxu0 %v1198_v52 }
  0x35   :  { %1092 = vmatpush3.bf16.msra.mxu1 %v1197_v51  ;;  %v973_v51 = vld [vmem:[%s1530_s2 + $0x1] ss:$0 sm:$0xff] }
  0x36   :  { %1093 = vmatprep.subr.bf16.mxu1 %v1227_v38 }
  0x37   :  { %1045 = vmatpush3.bf16.msra.mxu0 %v1199_v53 }
  0x38   :  { %1046 = vmatprep.subr.bf16.mxu0 %v1201_v55 }
  0x39   :  { %1094 = vmatpush3.bf16.msra.mxu1 %v1200_v54 }
  0x3a   :  { %1095 = vmatprep.subr.bf16.mxu1 %v1227_v38 }
  0x3b   :  { %1047 = vmatpush3.bf16.msra.mxu0 %v1202_v56 }
  0x3c   :  { %1048 = vmatprep.subr.bf16.mxu0 %v1204_v59 }
  0x3d   :  { %1096 = vmatpush3.bf16.msra.mxu1 %v1203_v57 }
  0x3e   :  { %1097 = vmatprep.subr.bf16.mxu1 %v1227_v38 }
  0x3f   :  { %1049 = vmatpush3.bf16.msra.mxu0 %v1205_v60 }
  0x40   :  { %1103 = vmatprep.subr.bf16.mxu0 %v1227_v38 }
  0x41   :  { %1098 = vmatpush3.bf16.msra.mxu1 %v1209_v61 }
  0x42   :  { %1123 = vmatprep.subr.bf16.mxu1 %v1227_v38  ;;  %629 = vmatmul.mubr.bf16.vlgmr.msra.gmra.mrb[4].mxu0 %v1206_v62 }
  0x43   :  { %1119 = vmatprep.mubr.msk.bf16.mxu0 %vm1228_vm0, %v1227_v38  ;;  %1104 = vmatpush3.bf16.msra.mxu0 %v1211_v0 }
  0x44   :  { %1100 = vmatmul.mubr.bf16.vlgmr.msra.gmra.mrb[4].mxu1 %v1210_v63  ;;  %1105 = vmatprep.subr.bf16.mxu0 %v1227_v38 }
  0x45   :  { %1139 = vmatprep.mubr.msk.bf16.mxu1 %vm1228_vm0, %v1227_v38  ;;  %1124 = vmatpush3.bf16.msra.mxu1 %v1219_v8 }
  0x46   :  { %1125 = vmatprep.subr.bf16.mxu1 %v1227_v38 }
  0x47   :  { %1106 = vmatpush3.bf16.msra.mxu0 %v1212_v1 }
  0x48   :  { %1107 = vmatprep.subr.bf16.mxu0 %v1227_v38 }
  0x49   :  { %1126 = vmatpush3.bf16.msra.mxu1 %v1220_v9 }
  0x4a   :  { %1127 = vmatprep.subr.bf16.mxu1 %v1227_v38 }
  0x4b   :  { %1108 = vmatpush3.bf16.msra.mxu0 %v1213_v2 }
  0x4c   :  { %1109 = vmatprep.subr.bf16.mxu0 %v1227_v38 }
  0x4d   :  { %1128 = vmatpush3.bf16.msra.mxu1 %v1221_v10 }
  0x4e   :  { %1129 = vmatprep.subr.bf16.mxu1 %v1227_v38 }
  0x4f   :  { %1110 = vmatpush3.bf16.msra.mxu0 %v1214_v3 }
  0x50   :  { %1111 = vmatprep.subr.bf16.mxu0 %v1227_v38 }
  0x51   :  { %1130 = vmatpush3.bf16.msra.mxu1 %v1222_v11 }
  0x52   :  { %1131 = vmatprep.subr.bf16.mxu1 %v1227_v38 }
  0x53   :  { %1112 = vmatpush3.bf16.msra.mxu0 %v1215_v4 }
  0x54   :  { %1113 = vmatprep.subr.bf16.mxu0 %v1227_v38 }
  0x55   :  { %1132 = vmatpush3.bf16.msra.mxu1 %v1223_v12 }
  0x56   :  { %1133 = vmatprep.subr.bf16.mxu1 %v1227_v38 }
  0x57   :  { %1114 = vmatpush3.bf16.msra.mxu0 %v1216_v5 }
  0x58   :  { %1115 = vmatprep.subr.bf16.mxu0 %v1227_v38 }
  0x59   :  { %1134 = vmatpush3.bf16.msra.mxu1 %v1224_v13 }
  0x5a   :  { %1135 = vmatprep.subr.bf16.mxu1 %v1227_v38 }
  0x5b   :  { %1116 = vmatpush3.bf16.msra.mxu0 %v1217_v6 }
  0x5c   :  { %1117 = vmatprep.subr.bf16.mxu0 %v1227_v38 }
  0x5d   :  { %1136 = vmatpush3.bf16.msra.mxu1 %v1225_v49 }
  0x5e   :  { %1137 = vmatprep.subr.bf16.mxu1 %v1227_v38 }
  0x5f   :  { %1118 = vmatpush3.bf16.msra.mxu0 %v1218_v7 }
  0x61   :  { %1138 = vmatpush3.bf16.msra.mxu1 %v1226_v50 }
  0xf5   :  { %v1006_v14 = vpop.f32.mrb[0].mxu0 }
  0xf6   :  { %v1007_v16 = vpop.f32.mrb[1].mxu0 }
  0xf7   :  { %v1008_v17 = vadd.f32 %v1007_v16, %v1006_v14  ;;  %v1009_v18 = vpop.f32.mrb[2].mxu0  ;;  %v1028_v19 = vpop.f32.mrb[0].mxu1 }
  0xf8   :  { %v1010_v20 = vpop.f32.mrb[3].mxu0  ;;  %v1029_v23 = vpop.f32.mrb[1].mxu1 }
  0xf9   :  { %v549_v21 = vadd.f32 %v1008_v17, %v908_v15  ;;  %v1011_v22 = vadd.f32 %v1010_v20, %v1009_v18  ;;  %v1030_v24 = vadd.f32 %v1029_v23, %v1028_v19  ;;  %v1031_v25 = vpop.f32.mrb[2].mxu1 }
  0xfa   :  { %v1032_v27 = vpop.f32.mrb[3].mxu1 }
  0xfb   :  { %v552_v26 = vadd.f32 %v1011_v22, %v908_v15  ;;  %v590_v28 = vadd.f32 %v1030_v24, %v549_v21  ;;  %v1033_v29 = vadd.f32 %v1032_v27, %v1031_v25 }
  0xfd   :  { %v593_v30 = vadd.f32 %v1033_v29, %v552_v26 }
 0x115   :  { %v1050_v31 = vpop.f32.mrb[4].mxu0 }
 0x116   :  { %v1051_v32 = vpop.f32.mrb[5].mxu0 }
 0x117   :  { %v671_v33 = vpop.f32.mrb[4].mxu1  ;;  %v1052_v34 = vadd.f32 %v1051_v32, %v1050_v31  ;;  %v1053_v35 = vpop.f32.mrb[6].mxu0 }
 0x118   :  { %v1101_v36 = vpop.f32.mrb[5].mxu1  ;;  %v1054_v37 = vpop.f32.mrb[7].mxu0 }
 0x119   :  { %v674_v39 = vpop.f32.mrb[6].mxu1  ;;  %v631_v40 = vadd.f32 %v1052_v34, %v590_v28  ;;  %v1055_v41 = vadd.f32 %v1054_v37, %v1053_v35 }
 0x11a   :  { %v1102_v42 = vpop.f32.mrb[7].mxu1 }
 0x11b   :  { %v672_v43 = vadd.f32 %v671_v33, %v631_v40  ;;  %v634_v44 = vadd.f32 %v1055_v41, %v593_v30 }
 0x11d   :  { %v675_v45 = vadd.f32 %v674_v39, %v634_v44  ;;  %v678_v46 = vmax.f32 %v672_v43, 0.0 }
 0x11f   :  { %v679_v47 = vmax.f32 %v675_v45, 0.0 }
 0x121   :  { %v680_v48 = vpack.c.bf16 %v679_v47, %v678_v46 }
 0x123   :  { %1120 = vmatmul.mubr.bf16.vlgmr.msra.gmra.mrb[8].mxu0 %v680_v48 }
 0x1f6   :  { %v787_v52 = vpop.f32.mrb[8].mxu0 }
 0x1f7   :  { %v788_v53 = vadd.f32 %v973_v51, %v787_v52  ;;  %v1121_v54 = vpop.f32.mrb[9].mxu0 }
 0x1f8   :  { %v790_v55 = vpop.f32.mrb[10].mxu0 }
 0x1f9   :  { %v791_v56 = vadd.f32 %v973_v51, %v790_v55  ;;  %v1122_v57 = vpop.f32.mrb[11].mxu0  ;;  %v794_v58 = vmax.f32 %v788_v53, 0.0 }
 0x1fb   :  { %v795_v59 = vmax.f32 %v791_v56, 0.0 }
 0x1fd   :  { %v796_v60 = vpack.c.bf16 %v795_v59, %v794_v58 }
 0x1ff   :  { %1140 = vmatmul.mubr.bf16.vlgmr.msra.gmra.mrb[8].mxu1 %v796_v60 }
 0x2d2   :  { %v895_v38 = vpop.f32.mrb[8].mxu1 }
 0x2d3   :  { %902 = vst [vmem:[%s1531_s3] sm:$0xff] %v895_v38  ;;  %v1141_v61 = vpop.f32.mrb[9].mxu1 }
 0x2d4   :  { %v898_v62 = vpop.f32.mrb[10].mxu1 }
 0x2d5   :  { %903 = vst [vmem:[%s1531_s3 + $0x8] sm:$0xff] %v898_v62  ;;  %v1142_v63 = vpop.f32.mrb[11].mxu1 }

</bundles_post_ra>
